<compile_context>
chip_gen: v6e
topology: v6e:2x2x1
jax: 0.10.0
libtpu: 0.0.40
codegen_flags: <defaults>
</compile_context>

<pallas_src>
import functools
import math

import jax
import jax.numpy as jnp
from jax.experimental import pallas as pl
from jax.experimental.pallas import tpu as pltpu


_LANE = 128
_TARGET_TILE_BYTES = 4 * 1024 * 1024  # ~4 MiB f32 output per grid step


def _sinusoidal_kernel(time_ref, freqmat_ref, mask_ref, out_ref, *, k):
    """One packed tile: out[r, j*dim + d] = sin/cos(t[r*k+j] * freq[d]).

    time_ref   : (TR, k)   packed timestep tile
    freqmat_ref: (k, L)    row j holds freq_full in lane slot j, zeros elsewhere
    mask_ref   : (1, L)    1.0 where the lane is a sin lane, 0.0 for cos lanes
    out_ref    : (TR, L)   lane-dense (L = k*dim, multiple of 128)
    """
    t = time_ref[...]
    # Exact per-lane scatter: for each lane only its owning j contributes a
    # nonzero product (bit-identical to the reference f32 multiply); the other
    # terms add exact zeros.  k is static and small, so this unrolls.
    args = t[:, 0:1] * freqmat_ref[0:1, :]
    for j in range(1, k):
        args = args + t[:, j:j + 1] * freqmat_ref[j:j + 1, :]
    # Single unmasked full-width store; select is bit-exact vs cat(sin, cos).
    out_ref[...] = jnp.where(mask_ref[...] > 0.5, jnp.sin(args), jnp.cos(args))


@functools.lru_cache(maxsize=None)
def _tables(dim: int, k: int):
    """Cached (k, k*dim) frequency scatter matrix and (1, k*dim) sin-lane mask."""
    half_dim = dim // 2
    scale = math.log(10000.0) / (half_dim - 1)
    freqs = jnp.exp(jnp.arange(half_dim, dtype=jnp.float32) * -scale)
    freq_full = jnp.concatenate([freqs, freqs])                     # (dim,)
    L = k * dim
    eye = jnp.eye(k, dtype=jnp.float32)                             # (k, k)
    # freqmat[j, j*dim + d] = freq_full[d]; zero elsewhere.
    freqmat = (eye[:, :, None] * freq_full[None, None, :]).reshape(k, L)
    sin_mask = (jnp.arange(L, dtype=jnp.int32) % dim) < half_dim
    sin_mask = sin_mask.astype(jnp.float32).reshape(1, L)
    return freqmat, sin_mask


def sinusoidal_position_embeddings(time: jax.Array, dim: int) -> jax.Array:
    """Equivalent of SinusoidalPositionEmbeddings(dim)(time) -> (B, dim) f32."""
    assert dim % 2 == 0, "dim must be even"
    assert dim >= 4, "dim must be >= 4 (dim == 2 divides by zero in the spec)"
    B = time.shape[0]

    # Pack k batch rows per lane-dense output row of width L = k*dim.
    k = _LANE // math.gcd(dim, _LANE)
    L = k * dim

    B_pad = pl.cdiv(B, k) * k
    R = B_pad // k                                   # packed output rows

    time_f32 = time.astype(jnp.float32)
    if B_pad != B:
        time_f32 = jnp.pad(time_f32, (0, B_pad - B))
    time2d = time_f32.reshape(R, k)

    freqmat, sin_mask = _tables(dim, k)

    # Byte-sized batch tile: ~_TARGET_TILE_BYTES of f32 output per grid step,
    # rounded down to a sublane multiple; full array when it all fits.
    tr = max(8, (_TARGET_TILE_BYTES // (4 * L)) // 8 * 8)
    if tr >= R:
        tr = R                                       # block == full array
    grid_r = pl.cdiv(R, tr)

    # Give both v7x TensorCores work when a single multi-MiB tile would
    # otherwise cover the whole output.
    if grid_r == 1 and R >= 16 and R * L * 4 >= (2 << 20):
        tr = ((R // 2 + 7) // 8) * 8
        grid_r = pl.cdiv(R, tr)

    # Scoped-VMEM budget: double-buffered in/out tiles + constants, with
    # headroom.  Safe on every generation (v5e scoped default 16 MiB, v7x
    # physical 64 MiB); with a ~4 MiB tile this stays at the 16 MiB floor.
    block_bytes = 4 * (tr * L + tr * k + k * L + L)
    vmem_limit = int(min(48 << 20, max(16 << 20, 3 * block_bytes)))

    out = pl.pallas_call(
        functools.partial(_sinusoidal_kernel, k=k),
        out_shape=jax.ShapeDtypeStruct((R, L), jnp.float32),
        grid=(grid_r,),
        in_specs=[
            pl.BlockSpec((tr, k), lambda i: (i, 0)),   # packed time tile
            pl.BlockSpec((k, L), lambda i: (0, 0)),    # shared freq scatter mat
            pl.BlockSpec((1, L), lambda i: (0, 0)),    # shared sin-lane mask
        ],
        out_specs=pl.BlockSpec((tr, L), lambda i: (i, 0)),
        compiler_params=pltpu.CompilerParams(
            dimension_semantics=("parallel",),
            vmem_limit_bytes=vmem_limit),
    )(time2d, freqmat, sin_mask)

    out = out.reshape(B_pad, dim)
    if B_pad != B:
        out = out[:B]
    return out


def _reference(time: jax.Array, dim: int) -> jax.Array:
    half_dim = dim // 2
    scale = math.log(10000.0) / (half_dim - 1)
    freqs = jnp.exp(jnp.arange(half_dim, dtype=jnp.float32) * -scale)
    args = time.astype(jnp.float32)[:, None] * freqs[None, :]
    return jnp.concatenate([jnp.sin(args), jnp.cos(args)], axis=-1)


if __name__ == "__main__":
    key = jax.random.PRNGKey(0)
    B, dim = 8, 32
    # diffusion-style timesteps
    time = jax.random.uniform(key, (B,), dtype=jnp.float32) * 1000.0

    out = sinusoidal_position_embeddings(time, dim)
    out = jax.block_until_ready(out)

    ref = _reference(time, dim)
    assert out.shape == (B, dim) and out.dtype == jnp.float32
    assert jnp.allclose(out, ref, atol=1e-5, rtol=1e-5)

    print("KERNEL_OK")
</pallas_src>

<mosaic_0001>
module attributes {stable_mosaic.version = 11 : i64} {
  func.func @_sinusoidal_kernel(%arg0: i32, %arg1: memref<2x4xf32, #tpu.memory_space<vmem>>, %arg2: memref<4x128xf32, #tpu.memory_space<vmem>>, %arg3: memref<1x128xf32, #tpu.memory_space<vmem>>, %arg4: memref<2x128xf32, #tpu.memory_space<vmem>>) attributes {dimension_semantics = [#tpu.dimension_semantics<parallel>], iteration_bounds = array<i64: 1>, scalar_prefetch = 0 : i64, scratch_operands = 0 : i64, tpu.core_type = #tpu.core_type<tc>, window_params = [{transform_indices = @transform_0, window_bounds = array<i64: 2, 4>}, {pipeline_mode = #tpu.pipeline_mode<synchronous>, transform_indices = @transform_1, window_bounds = array<i64: 4, 128>}, {pipeline_mode = #tpu.pipeline_mode<synchronous>, transform_indices = @transform_2, window_bounds = array<i64: 1, 128>}, {transform_indices = @transform_3, window_bounds = array<i64: 2, 128>}]} {
    %c0 = arith.constant 0 : index
    %c0_0 = arith.constant 0 : index
    %0 = vector.load %arg1[%c0, %c0_0] : memref<2x4xf32, #tpu.memory_space<vmem>>, vector<2x4xf32>
    %1 = vector.extract_strided_slice %0 {offsets = [0, 0], sizes = [2, 1], strides = [1, 1]} : vector<2x4xf32> to vector<2x1xf32>
    %c0_1 = arith.constant 0 : index
    %c0_2 = arith.constant 0 : index
    %2 = vector.load %arg2[%c0_1, %c0_2] : memref<4x128xf32, #tpu.memory_space<vmem>>, vector<1x128xf32>
    %3 = vector.broadcast %1 : vector<2x1xf32> to vector<2x128xf32>
    %4 = vector.broadcast %2 : vector<1x128xf32> to vector<2x128xf32>
    %5 = arith.mulf %3, %4 : vector<2x128xf32>
    %6 = vector.extract_strided_slice %0 {offsets = [0, 1], sizes = [2, 1], strides = [1, 1]} : vector<2x4xf32> to vector<2x1xf32>
    %c1 = arith.constant 1 : index
    %c0_3 = arith.constant 0 : index
    %7 = vector.load %arg2[%c1, %c0_3] : memref<4x128xf32, #tpu.memory_space<vmem>>, vector<1x128xf32>
    %8 = vector.broadcast %6 : vector<2x1xf32> to vector<2x128xf32>
    %9 = vector.broadcast %7 : vector<1x128xf32> to vector<2x128xf32>
    %10 = arith.mulf %8, %9 : vector<2x128xf32>
    %11 = arith.addf %5, %10 : vector<2x128xf32>
    %12 = vector.extract_strided_slice %0 {offsets = [0, 2], sizes = [2, 1], strides = [1, 1]} : vector<2x4xf32> to vector<2x1xf32>
    %c2 = arith.constant 2 : index
    %c0_4 = arith.constant 0 : index
    %13 = vector.load %arg2[%c2, %c0_4] : memref<4x128xf32, #tpu.memory_space<vmem>>, vector<1x128xf32>
    %14 = vector.broadcast %12 : vector<2x1xf32> to vector<2x128xf32>
    %15 = vector.broadcast %13 : vector<1x128xf32> to vector<2x128xf32>
    %16 = arith.mulf %14, %15 : vector<2x128xf32>
    %17 = arith.addf %11, %16 : vector<2x128xf32>
    %18 = vector.extract_strided_slice %0 {offsets = [0, 3], sizes = [2, 1], strides = [1, 1]} : vector<2x4xf32> to vector<2x1xf32>
    %c3 = arith.constant 3 : index
    %c0_5 = arith.constant 0 : index
    %19 = vector.load %arg2[%c3, %c0_5] : memref<4x128xf32, #tpu.memory_space<vmem>>, vector<1x128xf32>
    %20 = vector.broadcast %18 : vector<2x1xf32> to vector<2x128xf32>
    %21 = vector.broadcast %19 : vector<1x128xf32> to vector<2x128xf32>
    %22 = arith.mulf %20, %21 : vector<2x128xf32>
    %23 = arith.addf %17, %22 : vector<2x128xf32>
    %c0_6 = arith.constant 0 : index
    %c0_7 = arith.constant 0 : index
    %24 = vector.load %arg3[%c0_6, %c0_7] : memref<1x128xf32, #tpu.memory_space<vmem>>, vector<1x128xf32>
    %cst = arith.constant 5.000000e-01 : f32
    %25 = vector.broadcast %cst : f32 to vector<1x128xf32>
    %26 = arith.cmpf ogt, %24, %25 : vector<1x128xf32>
    %27 = math.sin %23 : vector<2x128xf32>
    %28 = math.cos %23 : vector<2x128xf32>
    %29 = vector.shape_cast %26 : vector<1x128xi1> to vector<1x128xi1>
    %30 = vector.broadcast %29 : vector<1x128xi1> to vector<2x128xi1>
    %31 = arith.select %30, %27, %28 : vector<2x128xi1>, vector<2x128xf32>
    %c0_8 = arith.constant 0 : index
    %c0_9 = arith.constant 0 : index
    %32 = vector.load %arg4[%c0_8, %c0_9] : memref<2x128xf32, #tpu.memory_space<vmem>>, vector<2x128xf32>
    tpu.vector_store %arg4[%c0_8, %c0_9], %31 {strides = array<i32>} : memref<2x128xf32, #tpu.memory_space<vmem>>, vector<2x128xf32>,
    return
  }
  func.func @transform_0(%arg0: i32) -> (i32, i32) {
    %c0_i32 = arith.constant 0 : i32
    %c0_i32_0 = arith.constant 0 : i32
    return %arg0, %c0_i32 : i32, i32
  }
  func.func @transform_1(%arg0: i32) -> (i32, i32) {
    %c0_i32 = arith.constant 0 : i32
    %c0_i32_0 = arith.constant 0 : i32
    %c0_i32_1 = arith.constant 0 : i32
    return %c0_i32, %c0_i32_0 : i32, i32
  }
  func.func @transform_2(%arg0: i32) -> (i32, i32) {
    %c0_i32 = arith.constant 0 : i32
    %c0_i32_0 = arith.constant 0 : i32
    %c0_i32_1 = arith.constant 0 : i32
    return %c0_i32, %c0_i32_0 : i32, i32
  }
  func.func @transform_3(%arg0: i32) -> (i32, i32) {
    %c0_i32 = arith.constant 0 : i32
    %c0_i32_0 = arith.constant 0 : i32
    return %arg0, %c0_i32 : i32, i32
  }
}

</mosaic_0001>

<bundles_post_ra>
// kernel: tpu_custom_call.1
= control target key start
LH: loop header
LB: loop body
LE: loop exit
PB: predicated region body
PF: predicated region fallthrough
CT: control target
= control target key end

     0   :  { %8 = vsyncpa [#allocation3], 0  ;;  %s490_s0 = inlined_call_operand.hbm [shape: f32[2,4], index: 0, kind: input, shape index: {}]   ;;  %s491_s1 = inlined_call_operand.hbm [shape: f32[4,128], index: 1, kind: input, shape index: {}]   ;;  %s492_s2 = inlined_call_operand.vmem [shape: f32[1,128], index: 2, kind: input, shape index: {}]   ;;  %s493_s3 = inlined_call_operand.hbm [shape: f32[2,128], index: 3, kind: output, shape index: {}]  }
   0x1   :  { %9 = vsyncpa [#allocation6], 0 }
   0x2   :  { %10 = vsyncpa [#allocation4], 0  ;;  %s421_s12 = smov [#allocation2]   ;;  %s422_s14 = smov [#allocation5]  }
   0x3   :  { %s17_s13 = sshll.u32 %s421_s12, 4  ;;  %s27_s15 = sshll.u32 %s422_s14, 4  ;;  %s18_s13 = int_to_ptr.vmem [resolvable:$true] %s17_s13  ;;  %s28_s15 = int_to_ptr.vmem [resolvable:$true] %s27_s15 }
   0x4   :  { %s363_s16 = scalar_lea.vmem %s18_s13, 32  ;;  %p368_p1 = scmp.lt.s32.totalorder %s18_s13, %s18_s13 }
   0x5   :  { %p364_p0 = scmp.ne.s32.totalorder %s18_s13, %s363_s16  ;;  %p369_p2 = scmp.lt.s32.totalorder %s363_s16, %s363_s16 }
   0x7   :  { %p370_p3 = por %p369_p2, %p368_p1 }
   0x9   :  { %p371_p4 = pnand %p370_p3, %p364_p0 }
   0xb   :  { %374 = shalt.err (!%p371_p4)
}
   0xc   :  { %20 = dma.hbm_to_vmem [thread:$0]  %s490_s0, 32, %s18_s13, [#allocation3]  }
   0xd   :  { %s383_s19 = scalar_lea.vmem %s28_s15, 64  ;;  %p388_p6 = scmp.lt.s32.totalorder %s28_s15, %s28_s15 }
   0xe   :  { %p384_p5 = scmp.ne.s32.totalorder %s28_s15, %s383_s19  ;;  %p389_p7 = scmp.lt.s32.totalorder %s383_s19, %s383_s19 }
  0x10   :  { %p390_p8 = por %p389_p7, %p388_p6 }
  0x12   :  { %p391_p9 = pnand %p390_p8, %p384_p5 }
  0x14   :  { %394 = shalt.err (!%p391_p9)
}
  0x15   :  { %30 = dma.hbm_to_vmem [thread:$0]  %s491_s1, 64, %s28_s15, [#allocation6]  }
  0x16   :  { %415 = dma.done.wait [#allocation3], 32  }
  0x17   :  { %416 = vsyncadd [#allocation3], 4294967264 }
  0x18   :  { %417 = dma.done.wait [#allocation6], 64  }
  0x19   :  { %418 = vsyncadd [#allocation6], 4294967232  ;;  %v423_v0 = vmov 0   ;;  %v424_v1 = vmov 2   ;;  %v39_v2 = vld [vmem:[#allocation2] sm:$0x3] }
  0x1a   :  { %346 = vset.pattern.permute.xlu0 %v423_v0  ;;  %348 = vset.pattern.permute.xlu1 %v424_v1  ;;  %v425_v3 = vmov 1   ;;  %v426_v4 = vmov 3   ;;  %v317_v7 = vld [vmem:[#allocation5] ss:$0 sm:$0xff]  ;;  %v318_v8 = vld [vmem:[#allocation5 + $0x1] ss:$0 sm:$0xff] }
  0x1b   :  { %43 = vperm.xlu0 %346, %v39_v2   ;;  %64 = vperm.xlu1 %348, %v39_v2   ;;  %v319_v9 = vld [vmem:[#allocation5 + $0x2] ss:$0 sm:$0xff]  ;;  %v320_v11 = vld [vmem:[#allocation5 + $0x3] ss:$0 sm:$0xff]  ;;  %v427_v30 = vmov 683565275  }
  0x1c   :  { %v428_v32 = vmov 2475754826   ;;  %v429_v35 = vmov 2131351028   ;;  %v430_v38 = vmov 2102212464  }
  0x1d   :  { %v431_v41 = vmov 920167782   ;;  %v432_v44 = vmov 1326507024  }
  0x1f   :  { %347 = vset.pattern.permute.xlu0 %v425_v3  ;;  %349 = vset.pattern.permute.xlu1 %v426_v4 }
  0x20   :  { %53 = vperm.xlu0 %347, %v39_v2   ;;  %75 = vperm.xlu1 %349, %v39_v2  }
  0x24   :  { %350 = vset.pattern.permute.xlu0 %v426_v4 }
  0x96   :  { %v44_v5 = vpop.permute.xlu0 %43  ;;  %v65_v6 = vpop.permute.xlu1 %64 }
  0x97   :  { %v50_v13 = vmul.f32 %v317_v7, %v44_v5  ;;  %v71_v15 = vmul.f32 %v319_v9, %v65_v6 }
  0x9b   :  { %v54_v10 = vpop.permute.xlu0 %53  ;;  %v76_v12 = vpop.permute.xlu1 %75 }
  0x9c   :  { %v60_v14 = vmul.f32 %v318_v8, %v54_v10  ;;  %v82_v17 = vmul.f32 %v320_v11, %v76_v12 }
  0x9e   :  { %v61_v16 = vadd.f32 %v60_v14, %v50_v13 }
  0xa0   :  { %v72_v18 = vadd.f32 %v71_v15, %v61_v16 }
  0xa2   :  { %v461_v19 = vadd.f32 %v82_v17, %v72_v18 }
  0xa4   :  { %v89_v20 = vand.u32 2139095040, %v461_v19  ;;  %v86_v24 = vand.u32 2147483647, %v461_v19  ;;  %vm88_vm7 = vcmp.lt.s32.totalorder %v461_v19, 0 }
  0xa6   :  { %v90_v21 = vshrl.u32 %v89_v20, 23  ;;  %v93_v27 = vand.u32 8388607, %v86_v24  ;;  %vm87_vm8 = vcmp.le.f32.partialorder %v86_v24, 0.7853982 }
  0xa8   :  { %v321_v22 = vadd.s32 4294967169, %v90_v21  ;;  %v94_v46 = vor.u32 8388608, %v93_v27 }
  0xaa   :  { %v96_v23 = vadd.s32 1, %v321_v22  ;;  %v134_v60 = vshll.u32 %v94_v46, 8 }
  0xac   :  { %vm97_vm0 = vcmp.gt.s32.totalorder %v96_v23, 0 }
  0xad   :  { %v98_v25 = vsel %vm97_vm0, %v96_v23, 0 }
  0xae   :  { %v100_v26 = vand.u32 31, %v98_v25  ;;  %v99_v29 = vshrl.u32 %v98_v25, 5 }
  0xb0   :  { %v101_v28 = vsub.s32 32, %v100_v26  ;;  %v103_v31 = vshll.u32 %v427_v30, %v100_v26  ;;  %v106_v33 = vshll.u32 %v428_v32, %v100_v26  ;;  %v109_v37 = vshll.u32 %v429_v35, %v100_v26 }
  0xb1   :  { %v112_v40 = vshll.u32 %v430_v38, %v100_v26  ;;  %v115_v43 = vshll.u32 %v431_v41, %v100_v26  ;;  %vm118_vm1 = vcmp.lt.s32.totalorder %v99_v29, 1  ;;  %vm121_vm2 = vcmp.lt.s32.totalorder %v99_v29, 4 }
  0xb2   :  { %v104_v34 = vshrl.u32 %v428_v32, %v101_v28  ;;  %v107_v36 = vshrl.u32 %v429_v35, %v101_v28  ;;  %v110_v39 = vshrl.u32 %v430_v38, %v101_v28  ;;  %v113_v42 = vshrl.u32 %v431_v41, %v101_v28 }
  0xb3   :  { %v116_v45 = vshrl.u32 %v432_v44, %v101_v28  ;;  %v102_v55 = vshrl.u32 %v427_v30, %v101_v28  ;;  %vm120_vm3 = vcmp.lt.s32.totalorder %v99_v29, 3  ;;  %vm119_vm4 = vcmp.lt.s32.totalorder %v99_v29, 2 }
  0xb4   :  { %v105_v47 = vor.u32 %v104_v34, %v103_v31  ;;  %v108_v48 = vor.u32 %v107_v36, %v106_v33  ;;  %v111_v49 = vor.u32 %v110_v39, %v109_v37  ;;  %v114_v50 = vor.u32 %v113_v42, %v112_v40  ;;  %v84_v40 = vld [vmem:[%s492_s2] sm:$0x1]  ;;  %s433_s2 = smov [#allocation7]  }
  0xb5   :  { %v117_v51 = vor.u32 %v116_v45, %v115_v43  ;;  %v294_v37 = vlaneseq  ;;  %vm85_vm9 = vcmp.gt.f32.partialorder %v84_v40, 0.5  ;;  %s307_s22 = sshll.u32 %s433_s2, 4  ;;  %s308_s22 = int_to_ptr.vmem [resolvable:$true] %s307_s22 }
  0xb6   :  { %v123_v52 = vsel %vm121_vm2, %v111_v49, 2102212464  ;;  %v126_v53 = vsel %vm118_vm1, %v105_v47, %v108_v48  ;;  %v130_v54 = vsel %vm118_vm1, %v108_v48, %v111_v49  ;;  %v127_v56 = vsel %vm121_vm2, %v114_v50, 920167782  ;;  %s395_s23 = scalar_lea.vmem %s308_s22, 32  ;;  %p400_p11 = scmp.lt.s32.totalorder %s308_s22, %s308_s22 }
  0xb7   :  { %v131_v57 = vsel %vm121_vm2, %v117_v51, 1326507024  ;;  %v128_v58 = vsel %vm120_vm3, %v111_v49, %v127_v56  ;;  %v122_v61 = vsel %vm118_vm1, %v102_v55, %v105_v47  ;;  %v124_v62 = vsel %vm120_vm3, %v108_v48, %v123_v52  ;;  %p396_p10 = scmp.ne.s32.totalorder %s308_s22, %s395_s23  ;;  %p401_p12 = scmp.lt.s32.totalorder %s395_s23, %s395_s23 }
  0xb8   :  { %v132_v59 = vsel %vm120_vm3, %v114_v50, %v131_v57  ;;  %v129_v63 = vsel %vm119_vm4, %v126_v53, %v128_v58  ;;  %v125_v6 = vsel %vm119_vm4, %v122_v61, %v124_v62  ;;  %v295_v41 = vshrl.u32 %v294_v37, 7 }
  0xb9   :  { %v133_v1 = vsel %vm119_vm4, %v130_v54, %v132_v59  ;;  %v470_v4 = vmul.u32.u64.low %v134_v60, %v129_v63  ;;  %v471_v5 = vmul.u32.u64.high %v134_v60, %v129_v63, %v470_v4  ;;  %v141_v8 = vmul.u32 %v134_v60, %v125_v6  ;;  %p402_p13 = por %p401_p12, %p400_p11 }
  0xba   :  { %v467_v2 = vmul.u32.u64.low %v134_v60, %v133_v1  ;;  %v468_v3 = vmul.u32.u64.high %v134_v60, %v133_v1, %v467_v2  ;;  %v296_v43 = vsub.s32 0, %v295_v41  ;;  %v293_v45 = vsel %vm85_vm9, 1, %v423_v0 }
  0xbb   :  { %v144_v7 = vadd.s32 1, %v471_v5  ;;  %vm178_vm1 = vweird.f32 %v461_v19  ;;  %p403_p0 = pnand %p402_p13, %p396_p10 }
  0xbc   :  { %vm143_vm5 = vc.u32 %v468_v3, %v470_v4  ;;  %v142_v21 = vadd.s32 %v470_v4, %v468_v3  ;;  %v297_v46 = vrot.slane %v293_v45, %v296_v43 }
  0xbd   :  { %v145_v9 = vsel %vm143_vm5, %v144_v7, %v471_v5 }
  0xbe   :  { %v146_v10 = vadd.s32 %v145_v9, %v141_v8  ;;  %vm298_vm10 = vcmp.eq.s32.totalorder %v297_v46, 1 }
  0xc0   :  { %v147_v11 = vadd.s32 536870912, %v146_v10 }
  0xc2   :  { %v148_v12 = vshrl.u32 %v147_v11, 30 }
  0xc4   :  { %v149_v13 = vshll.u32 %v148_v12, 30  ;;  %v172_v35 = vsub.s32 4, %v148_v12 }
  0xc6   :  { %v150_v14 = vsub.s32 %v146_v10, %v149_v13  ;;  %v173_v39 = vsel %vm88_vm7, %v172_v35, %v148_v12 }
  0xc7   :  { %v175_v42 = vsel %vm87_vm8, 0, %v173_v39 }
  0xc8   :  { %v152_v15 = vsub.s32 0, %v150_v14  ;;  %v179_v44 = vadd.s32 3, %v175_v42  ;;  %v283_v24 = vand.u32 3, %v175_v42 }
  0xca   :  { %v322_v16 = vmin.u32 %v152_v15, %v150_v14  ;;  %v180_v47 = vand.u32 3, %v179_v44  ;;  %vm288_vm12 = vcmp.eq.s32.totalorder %v283_v24, 2  ;;  %vm285_vm14 = vcmp.eq.s32.totalorder %v283_v24, 0 }
  0xcb   :  { %vm284_vm0 = vcmp.lt.s32.totalorder %v283_v24, 2 }
  0xcc   :  { %v154_v17 = vclz %v322_v16  ;;  %vm185_vm11 = vcmp.eq.s32.totalorder %v180_v47, 2  ;;  %vm182_vm13 = vcmp.eq.s32.totalorder %v180_v47, 0  ;;  %vm181_vm15 = vcmp.lt.s32.totalorder %v180_v47, 2 }
  0xce   :  { %v323_v18 = vadd.s32 4294967294, %v154_v17 }
  0xd0   :  { %vm324_vm6 = vcmp.lt.s32.totalorder %v323_v18, 0 }
  0xd1   :  { %v157_v20 = vsel %vm324_vm6, 0, %v323_v18 }
  0xd2   :  { %v158_v22 = vsub.s32 32, %v157_v20  ;;  %v162_v23 = vsub.s32 4294967266, %v157_v20  ;;  %v159_v25 = vshll.u32 %v150_v14, %v157_v20 }
  0xd4   :  { %v160_v26 = vshrl.u32 %v142_v21, %v158_v22  ;;  %v163_v27 = vadd.s32 127, %v162_v23 }
  0xd6   :  { %v161_v28 = vor.u32 %v160_v26, %v159_v25  ;;  %v164_v29 = vshll.u32 %v163_v27, 23 }
  0xd8   :  { %v165_v30 = vor.u32 4788187, %v164_v29  ;;  %v168_v32 = vcvt.s32.f32 %v161_v28 }
  0xda   :  { %v166_v31 = vand.u32 2147483647, %v165_v30 }
  0xdc   :  { %v169_v33 = vmul.f32 %v168_v32, %v166_v31 }
  0xde   :  { %v170_v34 = vxor.u32 2147483648, %v169_v33 }
  0xe0   :  { %v171_v36 = vsel %vm88_vm7, %v170_v34, %v169_v33 }
  0xe1   :  { %v174_v38 = vsel %vm87_vm8, %v461_v19, %v171_v36 }
  0xe2   :  { %351 = vcosq.f32 %v174_v38 }
  0xe3   :  { %353 = vsinq.f32 %v174_v38 }
  0xef   :  { %v352_v48 = vpop.eup %351 }
  0xf0   :  { %v354_v49 = vpop.eup %353  ;;  %v186_v50 = vxor.u32 2147483648, %v352_v48 }
  0xf1   :  { %v183_v51 = vxor.u32 2147483648, %v354_v49 }
  0xf2   :  { %v187_v52 = vsel %vm185_vm11, %v186_v50, %v354_v49  ;;  %v290_v53 = vsel %vm288_vm12, %v186_v50, %v354_v49 }
  0xf3   :  { %v184_v54 = vsel %vm182_vm13, %v352_v48, %v183_v51  ;;  %v287_v0 = vsel %vm285_vm14, %v352_v48, %v183_v51 }
  0xf4   :  { %v188_v55 = vsel %vm181_vm15, %v184_v54, %v187_v52  ;;  %v291_v56 = vsel %vm284_vm0, %v287_v0, %v290_v53 }
  0xf5   :  { %v189_v57 = vsel %vm178_vm1, nan, %v188_v55  ;;  %v292_v58 = vsel %vm178_vm1, nan, %v291_v56 }
  0xf6   :  { %v299_v59 = vsel %vm298_vm10, %v189_v57, %v292_v58 }
  0xf7   :  { %300 = vst [vmem:[#allocation7] sm:$0x3] %v299_v59 }
  0xf8   :  { %406 = shalt.err (!%p403_p0)
}
  0xf9   :  { %310 = dma.vmem_to_hbm [thread:$0]  %s308_s22, 32, %s493_s3, [#allocation4]  }
  0xfa   :  { %419 = dma.done.wait [#allocation4], 32  }
  0xfb   :  { %420 = vsyncadd [#allocation4], 4294967264 }
  0xfc   :  { %314 = vsyncpa [#allocation3], 1 }
  0xfd   :  { %315 = vsyncpa [#allocation6], 1 }
  0xfe   :  { %316 = vsyncpa [#allocation4], 1 }

</bundles_post_ra>
